<compile_context>
chip_gen: v5e
topology: v5e:2x2
jax: 0.10.0
libtpu: 0.0.40
codegen_flags: <defaults>
</compile_context>

<pallas_src>
import jax
import jax.numpy as jnp
from jax.experimental import pallas as pl
from jax.experimental.pallas import tpu as pltpu


def _round_up(x: int, m: int) -> int:
    return ((x + m - 1) // m) * m


def _uniform_boxes_kernel(seed_ref, scales_ref, out_ref):
    # seed_ref  : SMEM int32[1]       (scalar prefetch)
    # scales_ref: VMEM f32[B, 4]      rows are [w, h, w, h] per image
    # out_ref   : VMEM f32[4, B, TN]  rows are x1, y1, x2, y2 (lane axis = proposals)
    t = pl.program_id(0)
    num_tiles = pl.num_programs(0)
    B = scales_ref.shape[0]
    TN = out_ref.shape[2]
    n_total = num_tiles * TN  # padded number of proposals per image

    # Global (image, proposal) index for this tile, unique across the grid.
    img = jax.lax.broadcasted_iota(jnp.int32, (B, TN), 0)
    col = jax.lax.broadcasted_iota(jnp.int32, (B, TN), 1)
    base = img * n_total + (col + t * TN)  # in [0, B * n_total)

    # Mix the user seed in with an odd multiplier (decorrelates nearby seeds).
    seed_u = seed_ref[0].astype(jnp.uint32) * jnp.uint32(0x9E3779B9)

    def uniform(coord: int):
        # Stateless hash PRNG (lowbias32-style finalizer) -> uniform [0, 1).
        x = (base + coord * (B * n_total)).astype(jnp.uint32) ^ seed_u
        x = x ^ (x >> 16)
        x = x * jnp.uint32(0x21F0AAAD)
        x = x ^ (x >> 15)
        x = x * jnp.uint32(0x735A2D97)
        x = x ^ (x >> 15)
        # Top 23 bits -> exact int32 -> float32 in [0, 1).
        return (x >> 9).astype(jnp.int32).astype(jnp.float32) * jnp.float32(
            1.0 / (1 << 23)
        )

    cx = uniform(0)
    cy = uniform(1)
    bw = uniform(2)
    bh = uniform(3)

    # Per-image scales, broadcast along the lane (proposal) axis.
    wscale = scales_ref[:, 0:1]  # (B, 1)
    hscale = scales_ref[:, 1:2]  # (B, 1)

    half_w = 0.5 * bw
    half_h = 0.5 * bh
    out_ref[0] = (cx - half_w) * wscale  # x1
    out_ref[1] = (cy - half_h) * hscale  # y1
    out_ref[2] = (cx + half_w) * wscale  # x2
    out_ref[3] = (cy + half_h) * hscale  # y2


def uniform_random_boxes(num_proposal_boxes: int, scales: jnp.ndarray, seed: int = 0,
                         *, max_tile_n: int = 1024):
    """scales: (B, 4) rows of [w, h, w, h]. Returns (B, N, 4) float32 xyxy boxes."""
    B = scales.shape[0]
    N = int(num_proposal_boxes)
    scales_f32 = scales.reshape(B, 4).astype(jnp.float32)

    # Pad the proposal (lane) axis to a multiple of 128 for unmasked, dense
    # stores; extra columns are generated and sliced off in the wrapper.
    n_pad = max(128, _round_up(N, 128))
    tile_n = min(n_pad, max_tile_n)
    n_pad = _round_up(n_pad, tile_n)
    num_tiles = n_pad // tile_n

    grid_spec = pltpu.PrefetchScalarGridSpec(
        num_scalar_prefetch=1,
        grid=(num_tiles,),
        in_specs=[
            # Full (B, 4) scale table, resident across all grid steps.
            pl.BlockSpec((B, 4), lambda t, seed_ref: (0, 0)),
        ],
        out_specs=pl.BlockSpec((4, B, tile_n), lambda t, seed_ref: (0, 0, t)),
    )

    out = pl.pallas_call(
        _uniform_boxes_kernel,
        out_shape=jax.ShapeDtypeStruct((4, B, n_pad), jnp.float32),
        grid_spec=grid_spec,
        compiler_params=pltpu.CompilerParams(
            # Stateless PRNG -> tiles are independent; shard across TCs on v7x.
            dimension_semantics=("parallel",),
        ),
    )(jnp.asarray([seed], dtype=jnp.int32), scales_f32)

    # Layout plumbing back to the module's (N, 4) convention.
    return jnp.transpose(out[:, :, :N], (1, 2, 0))


def uniform_random_boxes_forward(num_proposal_boxes: int, batched_inputs, seed: int = 0):
    """Mirrors UniformRandomBoxes.forward: attaches 'proposal_boxes' to each dict."""
    scales = jnp.stack(
        [
            jnp.array(
                [bi["image"].shape[-1], bi["image"].shape[-2],
                 bi["image"].shape[-1], bi["image"].shape[-2]],
                dtype=jnp.float32,
            )
            for bi in batched_inputs
        ]
    )
    boxes = uniform_random_boxes(num_proposal_boxes, scales, seed)
    for i, bi in enumerate(batched_inputs):
        bi["proposal_boxes"] = boxes[i]
    return batched_inputs


if __name__ == "__main__":
    key = jax.random.PRNGKey(0)
    k1, k2 = jax.random.split(key)

    # Two images with different spatial sizes, (C, H, W) like PyTorch NCHW items.
    batched_inputs = [
        {"image": jax.random.normal(k1, (3, 16, 16), dtype=jnp.float32),
         "height": 16, "width": 16},
        {"image": jax.random.normal(k2, (3, 24, 32), dtype=jnp.float32),
         "height": 24, "width": 32},
    ]

    num_proposal_boxes = 8
    out = uniform_random_boxes_forward(num_proposal_boxes, batched_inputs, seed=0)
    boxes = jnp.stack([bi["proposal_boxes"] for bi in out])
    jax.block_until_ready(boxes)

    assert boxes.shape == (2, num_proposal_boxes, 4)
    assert boxes.dtype == jnp.float32
    assert bool(jnp.all(jnp.isfinite(boxes)))
    # x2 >= x1 and y2 >= y1 by construction (w, h >= 0).
    assert bool(jnp.all(boxes[..., 2] >= boxes[..., 0]))
    assert bool(jnp.all(boxes[..., 3] >= boxes[..., 1]))
    # With u in [0, 1), coordinates stay within [-0.5 * scale, 1.5 * scale].
    scales = jnp.stack(
        [jnp.array([bi["image"].shape[-1], bi["image"].shape[-2]] * 2, jnp.float32)
         for bi in out]
    )
    lo = -0.5 * scales[:, None, :]
    hi = 1.5 * scales[:, None, :]
    assert bool(jnp.all((boxes >= lo) & (boxes <= hi)))

    print("KERNEL_OK")
</pallas_src>

<mosaic_0001>
module attributes {stable_mosaic.version = 11 : i64} {
  func.func @_uniform_boxes_kernel(%arg0: i32, %arg1: memref<1xi32, #tpu.memory_space<smem>>, %arg2: memref<2x4xf32, #tpu.memory_space<vmem>>, %arg3: memref<4x2x128xf32, #tpu.memory_space<vmem>>) attributes {dimension_semantics = [#tpu.dimension_semantics<parallel>], iteration_bounds = array<i64: 1>, scalar_prefetch = 1 : i64, scratch_operands = 0 : i64, tpu.core_type = #tpu.core_type<tc>, window_params = [{pipeline_mode = #tpu.pipeline_mode<synchronous>, transform_indices = @transform_0, window_bounds = array<i64: 2, 4>}, {transform_indices = @transform_1, window_bounds = array<i64: 4, 2, 128>}]} {
    %0 = tpu.iota {dimensions = array<i32: 0>} : vector<2x128xi32>
    %1 = tpu.iota {dimensions = array<i32: 1>} : vector<2x128xi32>
    %c128_i32 = arith.constant 128 : i32
    %2 = vector.broadcast %c128_i32 : i32 to vector<2x128xi32>
    %3 = arith.muli %0, %2 : vector<2x128xi32>
    %c128_i32_0 = arith.constant 128 : i32
    %4 = arith.muli %arg0, %c128_i32_0 : i32
    %5 = vector.broadcast %4 : i32 to vector<2x128xi32>
    %6 = arith.addi %1, %5 : vector<2x128xi32>
    %7 = arith.addi %3, %6 : vector<2x128xi32>
    %c0 = arith.constant 0 : index
    %8 = memref.load %arg1[%c0] : memref<1xi32, #tpu.memory_space<smem>>
    %c-1640531527_i32 = arith.constant -1640531527 : i32
    %9 = arith.muli %8, %c-1640531527_i32 : i32
    %c0_i32 = arith.constant 0 : i32
    %10 = vector.broadcast %c0_i32 : i32 to vector<2x128xi32>
    %11 = arith.addi %7, %10 : vector<2x128xi32>
    %12 = vector.broadcast %9 : i32 to vector<2x128xi32>
    %13 = arith.xori %11, %12 : vector<2x128xi32>
    %c16_i32 = arith.constant 16 : i32
    %14 = vector.broadcast %c16_i32 : i32 to vector<2x128xi32>
    %15 = arith.shrui %13, %14 : vector<2x128xi32>
    %16 = arith.xori %13, %15 : vector<2x128xi32>
    %c569420461_i32 = arith.constant 569420461 : i32
    %17 = vector.broadcast %c569420461_i32 : i32 to vector<2x128xi32>
    %18 = arith.muli %16, %17 : vector<2x128xi32>
    %c15_i32 = arith.constant 15 : i32
    %19 = vector.broadcast %c15_i32 : i32 to vector<2x128xi32>
    %20 = arith.shrui %18, %19 : vector<2x128xi32>
    %21 = arith.xori %18, %20 : vector<2x128xi32>
    %c1935289751_i32 = arith.constant 1935289751 : i32
    %22 = vector.broadcast %c1935289751_i32 : i32 to vector<2x128xi32>
    %23 = arith.muli %21, %22 : vector<2x128xi32>
    %c15_i32_1 = arith.constant 15 : i32
    %24 = vector.broadcast %c15_i32_1 : i32 to vector<2x128xi32>
    %25 = arith.shrui %23, %24 : vector<2x128xi32>
    %26 = arith.xori %23, %25 : vector<2x128xi32>
    %c9_i32 = arith.constant 9 : i32
    %27 = vector.broadcast %c9_i32 : i32 to vector<2x128xi32>
    %28 = arith.shrui %26, %27 : vector<2x128xi32>
    %29 = arith.sitofp %28 : vector<2x128xi32> to vector<2x128xf32>
    %cst = arith.constant 1.1920929E-7 : f32
    %30 = vector.broadcast %cst : f32 to vector<2x128xf32>
    %31 = arith.mulf %29, %30 : vector<2x128xf32>
    %c256_i32 = arith.constant 256 : i32
    %32 = vector.broadcast %c256_i32 : i32 to vector<2x128xi32>
    %33 = arith.addi %7, %32 : vector<2x128xi32>
    %34 = vector.broadcast %9 : i32 to vector<2x128xi32>
    %35 = arith.xori %33, %34 : vector<2x128xi32>
    %c16_i32_2 = arith.constant 16 : i32
    %36 = vector.broadcast %c16_i32_2 : i32 to vector<2x128xi32>
    %37 = arith.shrui %35, %36 : vector<2x128xi32>
    %38 = arith.xori %35, %37 : vector<2x128xi32>
    %c569420461_i32_3 = arith.constant 569420461 : i32
    %39 = vector.broadcast %c569420461_i32_3 : i32 to vector<2x128xi32>
    %40 = arith.muli %38, %39 : vector<2x128xi32>
    %c15_i32_4 = arith.constant 15 : i32
    %41 = vector.broadcast %c15_i32_4 : i32 to vector<2x128xi32>
    %42 = arith.shrui %40, %41 : vector<2x128xi32>
    %43 = arith.xori %40, %42 : vector<2x128xi32>
    %c1935289751_i32_5 = arith.constant 1935289751 : i32
    %44 = vector.broadcast %c1935289751_i32_5 : i32 to vector<2x128xi32>
    %45 = arith.muli %43, %44 : vector<2x128xi32>
    %c15_i32_6 = arith.constant 15 : i32
    %46 = vector.broadcast %c15_i32_6 : i32 to vector<2x128xi32>
    %47 = arith.shrui %45, %46 : vector<2x128xi32>
    %48 = arith.xori %45, %47 : vector<2x128xi32>
    %c9_i32_7 = arith.constant 9 : i32
    %49 = vector.broadcast %c9_i32_7 : i32 to vector<2x128xi32>
    %50 = arith.shrui %48, %49 : vector<2x128xi32>
    %51 = arith.sitofp %50 : vector<2x128xi32> to vector<2x128xf32>
    %cst_8 = arith.constant 1.1920929E-7 : f32
    %52 = vector.broadcast %cst_8 : f32 to vector<2x128xf32>
    %53 = arith.mulf %51, %52 : vector<2x128xf32>
    %c512_i32 = arith.constant 512 : i32
    %54 = vector.broadcast %c512_i32 : i32 to vector<2x128xi32>
    %55 = arith.addi %7, %54 : vector<2x128xi32>
    %56 = vector.broadcast %9 : i32 to vector<2x128xi32>
    %57 = arith.xori %55, %56 : vector<2x128xi32>
    %c16_i32_9 = arith.constant 16 : i32
    %58 = vector.broadcast %c16_i32_9 : i32 to vector<2x128xi32>
    %59 = arith.shrui %57, %58 : vector<2x128xi32>
    %60 = arith.xori %57, %59 : vector<2x128xi32>
    %c569420461_i32_10 = arith.constant 569420461 : i32
    %61 = vector.broadcast %c569420461_i32_10 : i32 to vector<2x128xi32>
    %62 = arith.muli %60, %61 : vector<2x128xi32>
    %c15_i32_11 = arith.constant 15 : i32
    %63 = vector.broadcast %c15_i32_11 : i32 to vector<2x128xi32>
    %64 = arith.shrui %62, %63 : vector<2x128xi32>
    %65 = arith.xori %62, %64 : vector<2x128xi32>
    %c1935289751_i32_12 = arith.constant 1935289751 : i32
    %66 = vector.broadcast %c1935289751_i32_12 : i32 to vector<2x128xi32>
    %67 = arith.muli %65, %66 : vector<2x128xi32>
    %c15_i32_13 = arith.constant 15 : i32
    %68 = vector.broadcast %c15_i32_13 : i32 to vector<2x128xi32>
    %69 = arith.shrui %67, %68 : vector<2x128xi32>
    %70 = arith.xori %67, %69 : vector<2x128xi32>
    %c9_i32_14 = arith.constant 9 : i32
    %71 = vector.broadcast %c9_i32_14 : i32 to vector<2x128xi32>
    %72 = arith.shrui %70, %71 : vector<2x128xi32>
    %73 = arith.sitofp %72 : vector<2x128xi32> to vector<2x128xf32>
    %cst_15 = arith.constant 1.1920929E-7 : f32
    %74 = vector.broadcast %cst_15 : f32 to vector<2x128xf32>
    %75 = arith.mulf %73, %74 : vector<2x128xf32>
    %c768_i32 = arith.constant 768 : i32
    %76 = vector.broadcast %c768_i32 : i32 to vector<2x128xi32>
    %77 = arith.addi %7, %76 : vector<2x128xi32>
    %78 = vector.broadcast %9 : i32 to vector<2x128xi32>
    %79 = arith.xori %77, %78 : vector<2x128xi32>
    %c16_i32_16 = arith.constant 16 : i32
    %80 = vector.broadcast %c16_i32_16 : i32 to vector<2x128xi32>
    %81 = arith.shrui %79, %80 : vector<2x128xi32>
    %82 = arith.xori %79, %81 : vector<2x128xi32>
    %c569420461_i32_17 = arith.constant 569420461 : i32
    %83 = vector.broadcast %c569420461_i32_17 : i32 to vector<2x128xi32>
    %84 = arith.muli %82, %83 : vector<2x128xi32>
    %c15_i32_18 = arith.constant 15 : i32
    %85 = vector.broadcast %c15_i32_18 : i32 to vector<2x128xi32>
    %86 = arith.shrui %84, %85 : vector<2x128xi32>
    %87 = arith.xori %84, %86 : vector<2x128xi32>
    %c1935289751_i32_19 = arith.constant 1935289751 : i32
    %88 = vector.broadcast %c1935289751_i32_19 : i32 to vector<2x128xi32>
    %89 = arith.muli %87, %88 : vector<2x128xi32>
    %c15_i32_20 = arith.constant 15 : i32
    %90 = vector.broadcast %c15_i32_20 : i32 to vector<2x128xi32>
    %91 = arith.shrui %89, %90 : vector<2x128xi32>
    %92 = arith.xori %89, %91 : vector<2x128xi32>
    %c9_i32_21 = arith.constant 9 : i32
    %93 = vector.broadcast %c9_i32_21 : i32 to vector<2x128xi32>
    %94 = arith.shrui %92, %93 : vector<2x128xi32>
    %95 = arith.sitofp %94 : vector<2x128xi32> to vector<2x128xf32>
    %cst_22 = arith.constant 1.1920929E-7 : f32
    %96 = vector.broadcast %cst_22 : f32 to vector<2x128xf32>
    %97 = arith.mulf %95, %96 : vector<2x128xf32>
    %c0_23 = arith.constant 0 : index
    %c0_24 = arith.constant 0 : index
    %98 = vector.load %arg2[%c0_23, %c0_24] : memref<2x4xf32, #tpu.memory_space<vmem>>, vector<2x1xf32>
    %c0_25 = arith.constant 0 : index
    %c1 = arith.constant 1 : index
    %99 = vector.load %arg2[%c0_25, %c1] : memref<2x4xf32, #tpu.memory_space<vmem>>, vector<2x1xf32>
    %cst_26 = arith.constant 5.000000e-01 : f32
    %100 = vector.broadcast %cst_26 : f32 to vector<2x128xf32>
    %101 = arith.mulf %100, %75 : vector<2x128xf32>
    %cst_27 = arith.constant 5.000000e-01 : f32
    %102 = vector.broadcast %cst_27 : f32 to vector<2x128xf32>
    %103 = arith.mulf %102, %97 : vector<2x128xf32>
    %104 = arith.subf %31, %101 : vector<2x128xf32>
    %105 = vector.broadcast %98 : vector<2x1xf32> to vector<2x128xf32>
    %106 = arith.mulf %104, %105 : vector<2x128xf32>
    %c0_28 = arith.constant 0 : index
    %c0_29 = arith.constant 0 : index
    %c0_30 = arith.constant 0 : index
    %107 = vector.load %arg3[%c0_28, %c0_29, %c0_30] : memref<4x2x128xf32, #tpu.memory_space<vmem>>, vector<1x2x128xf32>
    %108 = vector.shape_cast %107 : vector<1x2x128xf32> to vector<2x128xf32>
    %109 = vector.shape_cast %106 : vector<2x128xf32> to vector<1x2x128xf32>
    tpu.vector_store %arg3[%c0_28, %c0_29, %c0_30], %109 {strides = array<i32>} : memref<4x2x128xf32, #tpu.memory_space<vmem>>, vector<1x2x128xf32>,
    %110 = arith.subf %53, %103 : vector<2x128xf32>
    %111 = vector.broadcast %99 : vector<2x1xf32> to vector<2x128xf32>
    %112 = arith.mulf %110, %111 : vector<2x128xf32>
    %c1_31 = arith.constant 1 : index
    %c0_32 = arith.constant 0 : index
    %c0_33 = arith.constant 0 : index
    %113 = vector.load %arg3[%c1_31, %c0_32, %c0_33] : memref<4x2x128xf32, #tpu.memory_space<vmem>>, vector<1x2x128xf32>
    %114 = vector.shape_cast %113 : vector<1x2x128xf32> to vector<2x128xf32>
    %115 = vector.shape_cast %112 : vector<2x128xf32> to vector<1x2x128xf32>
    tpu.vector_store %arg3[%c1_31, %c0_32, %c0_33], %115 {strides = array<i32>} : memref<4x2x128xf32, #tpu.memory_space<vmem>>, vector<1x2x128xf32>,
    %116 = arith.addf %31, %101 : vector<2x128xf32>
    %117 = vector.broadcast %98 : vector<2x1xf32> to vector<2x128xf32>
    %118 = arith.mulf %116, %117 : vector<2x128xf32>
    %c2 = arith.constant 2 : index
    %c0_34 = arith.constant 0 : index
    %c0_35 = arith.constant 0 : index
    %119 = vector.load %arg3[%c2, %c0_34, %c0_35] : memref<4x2x128xf32, #tpu.memory_space<vmem>>, vector<1x2x128xf32>
    %120 = vector.shape_cast %119 : vector<1x2x128xf32> to vector<2x128xf32>
    %121 = vector.shape_cast %118 : vector<2x128xf32> to vector<1x2x128xf32>
    tpu.vector_store %arg3[%c2, %c0_34, %c0_35], %121 {strides = array<i32>} : memref<4x2x128xf32, #tpu.memory_space<vmem>>, vector<1x2x128xf32>,
    %122 = arith.addf %53, %103 : vector<2x128xf32>
    %123 = vector.broadcast %99 : vector<2x1xf32> to vector<2x128xf32>
    %124 = arith.mulf %122, %123 : vector<2x128xf32>
    %c3 = arith.constant 3 : index
    %c0_36 = arith.constant 0 : index
    %c0_37 = arith.constant 0 : index
    %125 = vector.load %arg3[%c3, %c0_36, %c0_37] : memref<4x2x128xf32, #tpu.memory_space<vmem>>, vector<1x2x128xf32>
    %126 = vector.shape_cast %125 : vector<1x2x128xf32> to vector<2x128xf32>
    %127 = vector.shape_cast %124 : vector<2x128xf32> to vector<1x2x128xf32>
    tpu.vector_store %arg3[%c3, %c0_36, %c0_37], %127 {strides = array<i32>} : memref<4x2x128xf32, #tpu.memory_space<vmem>>, vector<1x2x128xf32>,
    return
  }
  func.func @transform_0(%arg0: i32, %arg1: memref<1xi32, #tpu.memory_space<smem>>) -> (i32, i32) {
    %c0_i32 = arith.constant 0 : i32
    %c0_i32_0 = arith.constant 0 : i32
    %c0_i32_1 = arith.constant 0 : i32
    return %c0_i32, %c0_i32_0 : i32, i32
  }
  func.func @transform_1(%arg0: i32, %arg1: memref<1xi32, #tpu.memory_space<smem>>) -> (i32, i32, i32) {
    %c0_i32 = arith.constant 0 : i32
    %c0_i32_0 = arith.constant 0 : i32
    %c0_i32_1 = arith.constant 0 : i32
    return %c0_i32, %c0_i32_0, %arg0 : i32, i32, i32
  }
}

</mosaic_0001>

<bundles_post_ra>
// kernel: tpu_custom_call.1
= control target key start
LH: loop header
LB: loop body
LE: loop exit
PB: predicated region body
PF: predicated region fallthrough
CT: control target
= control target key end

     0   :  { %v152_v1 = vmov 0   ;;  %s181_s0 = inlined_call_operand.<no memory space> [shape: s32[1], index: 0, kind: input, shape index: {}]   ;;  %s182_s1 = inlined_call_operand.vmem [shape: f32[2,4], index: 1, kind: input, shape index: {}]   ;;  %s183_s2 = inlined_call_operand.hbm [shape: f32[4,2,128], index: 2, kind: output, shape index: {}]  }
   0x1   :  { %v74_v0 = vld [vmem:[%s182_s1] sm:$0x3]  ;;  %124 = vset.pattern.permute.xlu0 %v152_v1 }
   0x2   :  { %8 = vsyncpa [#allocation5], 0  ;;  %80 = vperm.xlu0 %124, %v74_v0   ;;  %v153_v2 = vmov 1   ;;  %v11_v3 = vlaneseq  ;;  %s21_s13 = smul.u32 2654435769, %s181_s0  ;;  %s154_s0 = smov [#allocation4]  }
   0x3   :  { %s105_s1 = sshll.u32 %s154_s0, 4  ;;  %s107_s16 = sshll.u32 %s183_s2, 4  ;;  %s106_s1 = int_to_ptr.vmem [resolvable:$true] %s105_s1  ;;  %s108_s16 = int_to_ptr.hbm [resolvable:$true] %s107_s16 }
   0x4   :  { %v12_v4 = vshrl.u32 %v11_v3, 7  ;;  %v14_v5 = vand.u32 127, %v11_v3  ;;  %v22_v9 = vstv %s21_s13  ;;  %s155_s17 = smov 32   ;;  %s156_s18 = smov 2  }
   0x6   :  { %v15_v6 = vmul.u32 128, %v12_v4 }
   0x8   :  { %v19_v7 = vadd.s32 %v15_v6, %v14_v5 }
   0xa   :  { %125 = vset.pattern.permute.xlu0 %v153_v2  ;;  %v48_v8 = vadd.s32 512, %v19_v7  ;;  %v23_v11 = vxor.u32 %v22_v9, %v19_v7  ;;  %v61_v13 = vadd.s32 768, %v19_v7  ;;  %v35_v16 = vadd.s32 256, %v19_v7 }
   0xb   :  { %87 = vperm.xlu0 %125, %v74_v0  }
   0xc   :  { %v49_v10 = vxor.u32 %v48_v8, %v22_v9  ;;  %v24_v14 = vshrl.u32 %v23_v11, 16  ;;  %v62_v17 = vxor.u32 %v61_v13, %v22_v9  ;;  %v36_v20 = vxor.u32 %v35_v16, %v22_v9 }
   0xe   :  { %v50_v12 = vshrl.u32 %v49_v10, 16  ;;  %v25_v18 = vxor.u32 %v24_v14, %v23_v11  ;;  %v63_v21 = vshrl.u32 %v62_v17, 16  ;;  %v37_v24 = vshrl.u32 %v36_v20, 16 }
  0x10   :  { %v51_v15 = vxor.u32 %v50_v12, %v49_v10  ;;  %v26_v22 = vmul.u32 569420461, %v25_v18  ;;  %v64_v25 = vxor.u32 %v63_v21, %v62_v17  ;;  %v38_v28 = vxor.u32 %v37_v24, %v36_v20 }
  0x12   :  { %v52_v19 = vmul.u32 569420461, %v51_v15  ;;  %v27_v26 = vshrl.u32 %v26_v22, 15  ;;  %v65_v29 = vmul.u32 569420461, %v64_v25 }
  0x13   :  { %v39_v32 = vmul.u32 569420461, %v38_v28 }
  0x14   :  { %v53_v23 = vshrl.u32 %v52_v19, 15  ;;  %v28_v30 = vxor.u32 %v27_v26, %v26_v22  ;;  %v66_v33 = vshrl.u32 %v65_v29, 15 }
  0x15   :  { %v40_v36 = vshrl.u32 %v39_v32, 15 }
  0x16   :  { %v54_v27 = vxor.u32 %v53_v23, %v52_v19  ;;  %v29_v34 = vmul.u32 1935289751, %v28_v30  ;;  %v67_v37 = vxor.u32 %v66_v33, %v65_v29 }
  0x17   :  { %v41_v40 = vxor.u32 %v40_v36, %v39_v32 }
  0x18   :  { %v55_v31 = vmul.u32 1935289751, %v54_v27  ;;  %v30_v38 = vshrl.u32 %v29_v34, 15  ;;  %v68_v41 = vmul.u32 1935289751, %v67_v37 }
  0x19   :  { %v42_v44 = vmul.u32 1935289751, %v41_v40 }
  0x1a   :  { %v56_v35 = vshrl.u32 %v55_v31, 15  ;;  %v31_v42 = vxor.u32 %v30_v38, %v29_v34  ;;  %v69_v45 = vshrl.u32 %v68_v41, 15 }
  0x1b   :  { %v43_v48 = vshrl.u32 %v42_v44, 15 }
  0x1c   :  { %v57_v39 = vxor.u32 %v56_v35, %v55_v31  ;;  %v32_v46 = vshrl.u32 %v31_v42, 9  ;;  %v70_v49 = vxor.u32 %v69_v45, %v68_v41 }
  0x1d   :  { %v44_v52 = vxor.u32 %v43_v48, %v42_v44 }
  0x1e   :  { %v58_v43 = vshrl.u32 %v57_v39, 9  ;;  %v33_v50 = vcvt.s32.f32 %v32_v46  ;;  %v71_v53 = vshrl.u32 %v70_v49, 9 }
  0x1f   :  { %v45_v56 = vshrl.u32 %v44_v52, 9 }
  0x20   :  { %v59_v47 = vcvt.s32.f32 %v58_v43  ;;  %v34_v54 = vmul.f32 1.1920929e-07, %v33_v50  ;;  %v72_v57 = vcvt.s32.f32 %v71_v53 }
  0x21   :  { %v46_v60 = vcvt.s32.f32 %v45_v56 }
  0x22   :  { %v60_v51 = vmul.f32 1.1920929e-07, %v59_v47  ;;  %v73_v61 = vmul.f32 1.1920929e-07, %v72_v57 }
  0x23   :  { %v47_v1 = vmul.f32 1.1920929e-07, %v46_v60 }
  0x24   :  { %v75_v55 = vmul.f32 0.5, %v60_v51  ;;  %v76_v2 = vmul.f32 0.5, %v73_v61 }
  0x26   :  { %v77_v58 = vsub.f32 %v34_v54, %v75_v55  ;;  %v93_v59 = vadd.f32 %v75_v55, %v34_v54  ;;  %v85_v3 = vsub.f32 %v47_v1, %v76_v2  ;;  %v97_v4 = vadd.f32 %v76_v2, %v47_v1 }
  0x74   :  { %v81_v62 = vpop.permute.xlu0 %80 }
  0x75   :  { %v83_v63 = vmul.f32 %v81_v62, %v77_v58  ;;  %v94_v0 = vmul.f32 %v93_v59, %v81_v62 }
  0x77   :  { %84 = vst [vmem:[#allocation4] sm:$0x3] %v83_v63 }
  0x78   :  { %96 = vst [vmem:[#allocation4 + $0x4] sm:$0x3] %v94_v0 }
  0x7d   :  { %v88_v5 = vpop.permute.xlu0 %87 }
  0x7e   :  { %v90_v6 = vmul.f32 %v88_v5, %v85_v3  ;;  %v98_v7 = vmul.f32 %v97_v4, %v88_v5 }
  0x80   :  { %92 = vst [vmem:[#allocation4 + $0x2] sm:$0x3] %v90_v6 }
  0x81   :  { %100 = vst [vmem:[#allocation4 + $0x6] sm:$0x3] %v98_v7 }
  0x82   :  { %113 = dma.vmem_to_hbm [thread:$0]  %s106_s1, 128, %s108_s16, [#allocation5], %s155_s17, %s155_s17, %s156_s18  }
  0x83   :  { %150 = dma.done.wait [#allocation5], 128  }
  0x84   :  { %151 = vsyncadd [#allocation5], 4294967168 }
  0x85   :  { %118 = vsyncpa [#allocation5], 1 }

</bundles_post_ra>
